<compile_context>
chip_gen: v7x
topology: tpu7x:2x2x1
jax: 0.10.0
libtpu: 0.0.40
codegen_flags: <defaults>
</compile_context>

<pallas_src>
import functools

import jax
import jax.numpy as jnp
from jax.experimental import pallas as pl
from jax.experimental.pallas import tpu as pltpu

LANE = 128
SUBLANE = 8
NEG_SLOPE = 0.01


def _round_up(x, m):
    return ((x + m - 1) // m) * m


def _mlp_kernel(x_ref, w_ref, b_ref, o_ref, *, n_layers, out_pad,
                write_intermediates):
    """Fused MLP forward: all layers in one kernel invocation.

    x_ref : [TB, in0]            real (un-padded) input width
    w_ref : [L, ROWP, OUTP]      pre-transposed, zero-padded weights
    b_ref : [L, 1, OUTP]         zero-padded biases
    o_ref : [TB, L*OUTP] (or [TB, OUTP] if write_intermediates=False)
    Layers 0..L-2 apply LeakyReLU(0.01); the last layer is linear only.
    Activations stay in vregs/VMEM between layers (no HBM round-trip).
    """
    h = x_ref[...]
    for i in range(n_layers):
        k = h.shape[1]                       # real width (layer 0) or OUTP
        w = w_ref[i, :k, :]                  # static slice of packed weights
        y = jnp.dot(h, w, preferred_element_type=jnp.float32) + b_ref[i]
        if i < n_layers - 1:
            y = jnp.maximum(y, NEG_SLOPE * y)   # LeakyReLU, slope in (0,1)
        if write_intermediates:
            o_ref[:, i * out_pad:(i + 1) * out_pad] = y.astype(o_ref.dtype)
        elif i == n_layers - 1:
            o_ref[...] = y.astype(o_ref.dtype)
        h = y


def prepare_params(params):
    """One-time conversion of PyTorch-layout params (W[out,in], b[out]) into a
    single packed, pre-transposed, lane-dense weight tensor and bias tensor.

    Zero padding keeps the math exact: padded input columns hit zero weight
    rows, padded output columns get zero bias (and LeakyReLU(0) == 0), so pad
    lanes never contaminate real columns downstream.
    """
    n_layers = len(params)
    layer_dims = tuple((int(w.shape[1]), int(w.shape[0])) for w, _ in params)
    in0 = layer_dims[0][0]
    out_pad = max(_round_up(d_out, LANE) for _, d_out in layer_dims)
    row_pad = max(_round_up(in0, SUBLANE), out_pad)

    w_packed = jnp.zeros((n_layers, row_pad, out_pad), jnp.float32)
    b_packed = jnp.zeros((n_layers, 1, out_pad), jnp.float32)
    for l, (w, b) in enumerate(params):
        d_out, d_in = int(w.shape[0]), int(w.shape[1])
        w_packed = w_packed.at[l, :d_in, :d_out].set(
            jnp.transpose(w).astype(jnp.float32))
        b_packed = b_packed.at[l, 0, :d_out].set(b.astype(jnp.float32))

    # One-time sanity check: exactness of the padded matmuls relies on the pad
    # region being exactly zero.
    for l, (d_in, d_out) in enumerate(layer_dims):
        assert bool(jnp.all(w_packed[l, d_in:, :] == 0.0))
        assert bool(jnp.all(w_packed[l, :, d_out:] == 0.0))
        assert bool(jnp.all(b_packed[l, 0, d_out:] == 0.0))

    return w_packed, b_packed, layer_dims


def make_mlp_forward(layer_dims, *, max_tb=512, write_intermediates=True):
    """Build a jitted fused-forward callable for fixed layer dims.

    Returned fn: (x [B, in0], w_packed, b_packed) -> (final, [all layer outs])
    matching NeuralNetwork.forward (intermediates include the final output).
    """
    n_layers = len(layer_dims)
    in0 = layer_dims[0][0]
    out_pad = max(_round_up(d_out, LANE) for _, d_out in layer_dims)
    row_pad = max(_round_up(in0, SUBLANE), out_pad)
    out_width = n_layers * out_pad if write_intermediates else out_pad

    def forward(x, w_packed, b_packed):
        assert x.shape[1] == in0
        assert w_packed.shape == (n_layers, row_pad, out_pad)
        assert b_packed.shape == (n_layers, 1, out_pad)
        B = x.shape[0]

        # Batch tile: padding never exceeds one sublane-group per grid step.
        # (v7x megacore note: splitting into >=2 steps only pays once per-core
        # compute exceeds the ~0.35us/step overhead -- not at these widths.)
        num_steps = (B + max_tb - 1) // max_tb
        TB = _round_up((B + num_steps - 1) // num_steps, SUBLANE)
        B_pad = _round_up(B, TB)

        x = x.astype(jnp.float32)
        if B_pad != B:
            x = jnp.pad(x, ((0, B_pad - B), (0, 0)))   # rows only, no lane pad

        kernel = functools.partial(
            _mlp_kernel, n_layers=n_layers, out_pad=out_pad,
            write_intermediates=write_intermediates)

        # FLOPs: layer 0 is (TB,in0)@(in0,OUTP); later layers are OUTPxOUTP.
        flops = 2 * B_pad * (in0 * out_pad + (n_layers - 1) * out_pad * out_pad)
        bytes_accessed = 4 * (B_pad * in0 + w_packed.size + b_packed.size
                              + B_pad * out_width)

        out = pl.pallas_call(
            kernel,
            grid=(B_pad // TB,),
            in_specs=[
                # x keeps its REAL width (block last-dim == full array dim).
                pl.BlockSpec((TB, in0), lambda i: (i, 0)),
                # Packed weights / biases: tiny, resident across all steps.
                pl.BlockSpec((n_layers, row_pad, out_pad),
                             lambda i: (0, 0, 0)),
                pl.BlockSpec((n_layers, 1, out_pad), lambda i: (0, 0, 0)),
            ],
            out_specs=pl.BlockSpec((TB, out_width), lambda i: (i, 0)),
            out_shape=jax.ShapeDtypeStruct((B_pad, out_width), jnp.float32),
            compiler_params=pltpu.CompilerParams(
                dimension_semantics=("parallel",),
            ),
            cost_estimate=pl.CostEstimate(
                flops=flops, transcendentals=0,
                bytes_accessed=bytes_accessed),
        )(x, w_packed, b_packed)

        # Slice the single packed output back into real per-layer shapes.
        if write_intermediates:
            results = [
                out[:B, i * out_pad:i * out_pad + d_out]
                for i, (_, d_out) in enumerate(layer_dims)
            ]
            return results[-1], results
        final = out[:B, :layer_dims[-1][1]]
        return final, [final]

    return jax.jit(forward)


def init_params(key, num_nodes_per_layer):
    """Deterministic init matching nn.Linear default: U(-1/sqrt(in), 1/sqrt(in)).
    Weights kept in PyTorch layout W[out, in]."""
    params = []
    for i in range(len(num_nodes_per_layer) - 1):
        fan_in = num_nodes_per_layer[i]
        fan_out = num_nodes_per_layer[i + 1]
        key, kw, kb = jax.random.split(key, 3)
        bound = 1.0 / (fan_in ** 0.5)
        w = jax.random.uniform(kw, (fan_out, fan_in), jnp.float32, -bound, bound)
        b = jax.random.uniform(kb, (fan_out,), jnp.float32, -bound, bound)
        params.append((w, b))
    return params


if __name__ == "__main__":
    # Layer widths analogous to the original checkpoint's MLP (synthetic).
    num_nodes_per_layer = [32, 64, 48, 16]
    batch = 8

    key = jax.random.PRNGKey(0)
    key, kx = jax.random.split(key)
    x = jax.random.normal(kx, (batch, num_nodes_per_layer[0]), jnp.float32)
    params = init_params(key, num_nodes_per_layer)

    # One-time prep (transpose + pack + lane padding), outside the hot path.
    w_packed, b_packed, layer_dims = prepare_params(params)
    mlp_forward = make_mlp_forward(layer_dims)

    out, intermediates = mlp_forward(x, w_packed, b_packed)
    jax.block_until_ready(out)
    for t in intermediates:
        jax.block_until_ready(t)

    # Pure-JAX reference of the same forward pass (PyTorch semantics).
    ref = x
    ref_inter = []
    for w, b in params[:-1]:
        ref = ref @ w.T + b
        ref = jnp.where(ref > 0, ref, 0.01 * ref)
        ref_inter.append(ref)
    w, b = params[-1]
    ref = ref @ w.T + b
    ref_inter.append(ref)

    assert out.shape == (batch, num_nodes_per_layer[-1])
    assert len(intermediates) == len(num_nodes_per_layer) - 1
    assert jnp.allclose(out, ref, atol=1e-5, rtol=1e-5)
    for a, r in zip(intermediates, ref_inter):
        assert a.shape == r.shape
        assert jnp.allclose(a, r, atol=1e-5, rtol=1e-5)

    print("KERNEL_OK")
</pallas_src>

<mosaic_0001>
module attributes {stable_mosaic.version = 11 : i64} {
  func.func @_mlp_kernel(%arg0: i32, %arg1: memref<8x32xf32, #tpu.memory_space<vmem>>, %arg2: memref<3x128x128xf32, #tpu.memory_space<vmem>>, %arg3: memref<3x1x128xf32, #tpu.memory_space<vmem>>, %arg4: memref<8x384xf32, #tpu.memory_space<vmem>>) attributes {dimension_semantics = [#tpu.dimension_semantics<parallel>], iteration_bounds = array<i64: 1>, scalar_prefetch = 0 : i64, scratch_operands = 0 : i64, tpu.core_type = #tpu.core_type<tc>, window_params = [{transform_indices = @transform_0, window_bounds = array<i64: 8, 32>}, {pipeline_mode = #tpu.pipeline_mode<synchronous>, transform_indices = @transform_1, window_bounds = array<i64: 3, 128, 128>}, {pipeline_mode = #tpu.pipeline_mode<synchronous>, transform_indices = @transform_2, window_bounds = array<i64: 3, 1, 128>}, {transform_indices = @transform_3, window_bounds = array<i64: 8, 384>}]} {
    %c0 = arith.constant 0 : index
    %c0_0 = arith.constant 0 : index
    %0 = vector.load %arg1[%c0, %c0_0] : memref<8x32xf32, #tpu.memory_space<vmem>>, vector<8x32xf32>
    %c0_1 = arith.constant 0 : index
    %c0_2 = arith.constant 0 : index
    %c0_3 = arith.constant 0 : index
    %1 = vector.load %arg2[%c0_1, %c0_2, %c0_3] : memref<3x128x128xf32, #tpu.memory_space<vmem>>, vector<1x32x128xf32>
    %2 = vector.shape_cast %1 : vector<1x32x128xf32> to vector<32x128xf32>
    %cst = arith.constant dense<0.000000e+00> : vector<8x128xf32>
    %3 = tpu.matmul %0, %2, %cst {dimension_numbers = #tpu.dot_dimension_numbers<[1], [0], [0], [1], [0, 0, 1, 1], [], []>} : vector<8x32xf32>, vector<32x128xf32>, vector<8x128xf32> -> vector<8x128xf32>
    %c0_4 = arith.constant 0 : index
    %c0_5 = arith.constant 0 : index
    %c0_6 = arith.constant 0 : index
    %4 = vector.load %arg3[%c0_4, %c0_5, %c0_6] : memref<3x1x128xf32, #tpu.memory_space<vmem>>, vector<1x1x128xf32>
    %5 = vector.shape_cast %4 : vector<1x1x128xf32> to vector<1x128xf32>
    %6 = vector.broadcast %5 : vector<1x128xf32> to vector<8x128xf32>
    %7 = arith.addf %3, %6 : vector<8x128xf32>
    %cst_7 = arith.constant 0.00999999977 : f32
    %8 = vector.broadcast %cst_7 : f32 to vector<8x128xf32>
    %9 = arith.mulf %8, %7 : vector<8x128xf32>
    %10 = arith.maximumf %7, %9 : vector<8x128xf32>
    %c0_8 = arith.constant 0 : index
    %c0_9 = arith.constant 0 : index
    %11 = vector.load %arg4[%c0_8, %c0_9] : memref<8x384xf32, #tpu.memory_space<vmem>>, vector<8x128xf32>
    tpu.vector_store %arg4[%c0_8, %c0_9], %10 {strides = array<i32>} : memref<8x384xf32, #tpu.memory_space<vmem>>, vector<8x128xf32>,
    %c1 = arith.constant 1 : index
    %c0_10 = arith.constant 0 : index
    %c0_11 = arith.constant 0 : index
    %12 = vector.load %arg2[%c1, %c0_10, %c0_11] : memref<3x128x128xf32, #tpu.memory_space<vmem>>, vector<1x128x128xf32>
    %13 = vector.shape_cast %12 : vector<1x128x128xf32> to vector<128x128xf32>
    %cst_12 = arith.constant dense<0.000000e+00> : vector<8x128xf32>
    %14 = tpu.matmul %10, %13, %cst_12 {dimension_numbers = #tpu.dot_dimension_numbers<[1], [0], [0], [1], [0, 0, 1, 1], [], []>} : vector<8x128xf32>, vector<128x128xf32>, vector<8x128xf32> -> vector<8x128xf32>
    %c1_13 = arith.constant 1 : index
    %c0_14 = arith.constant 0 : index
    %c0_15 = arith.constant 0 : index
    %15 = vector.load %arg3[%c1_13, %c0_14, %c0_15] : memref<3x1x128xf32, #tpu.memory_space<vmem>>, vector<1x1x128xf32>
    %16 = vector.shape_cast %15 : vector<1x1x128xf32> to vector<1x128xf32>
    %17 = vector.broadcast %16 : vector<1x128xf32> to vector<8x128xf32>
    %18 = arith.addf %14, %17 : vector<8x128xf32>
    %cst_16 = arith.constant 0.00999999977 : f32
    %19 = vector.broadcast %cst_16 : f32 to vector<8x128xf32>
    %20 = arith.mulf %19, %18 : vector<8x128xf32>
    %21 = arith.maximumf %18, %20 : vector<8x128xf32>
    %c0_17 = arith.constant 0 : index
    %c128 = arith.constant 128 : index
    %22 = vector.load %arg4[%c0_17, %c128] : memref<8x384xf32, #tpu.memory_space<vmem>>, vector<8x128xf32>
    tpu.vector_store %arg4[%c0_17, %c128], %21 {strides = array<i32>} : memref<8x384xf32, #tpu.memory_space<vmem>>, vector<8x128xf32>,
    %c2 = arith.constant 2 : index
    %c0_18 = arith.constant 0 : index
    %c0_19 = arith.constant 0 : index
    %23 = vector.load %arg2[%c2, %c0_18, %c0_19] : memref<3x128x128xf32, #tpu.memory_space<vmem>>, vector<1x128x128xf32>
    %24 = vector.shape_cast %23 : vector<1x128x128xf32> to vector<128x128xf32>
    %cst_20 = arith.constant dense<0.000000e+00> : vector<8x128xf32>
    %25 = tpu.matmul %21, %24, %cst_20 {dimension_numbers = #tpu.dot_dimension_numbers<[1], [0], [0], [1], [0, 0, 1, 1], [], []>} : vector<8x128xf32>, vector<128x128xf32>, vector<8x128xf32> -> vector<8x128xf32>
    %c2_21 = arith.constant 2 : index
    %c0_22 = arith.constant 0 : index
    %c0_23 = arith.constant 0 : index
    %26 = vector.load %arg3[%c2_21, %c0_22, %c0_23] : memref<3x1x128xf32, #tpu.memory_space<vmem>>, vector<1x1x128xf32>
    %27 = vector.shape_cast %26 : vector<1x1x128xf32> to vector<1x128xf32>
    %28 = vector.broadcast %27 : vector<1x128xf32> to vector<8x128xf32>
    %29 = arith.addf %25, %28 : vector<8x128xf32>
    %c0_24 = arith.constant 0 : index
    %c256 = arith.constant 256 : index
    %30 = vector.load %arg4[%c0_24, %c256] : memref<8x384xf32, #tpu.memory_space<vmem>>, vector<8x128xf32>
    tpu.vector_store %arg4[%c0_24, %c256], %29 {strides = array<i32>} : memref<8x384xf32, #tpu.memory_space<vmem>>, vector<8x128xf32>,
    return
  }
  func.func @transform_0(%arg0: i32) -> (i32, i32) {
    %c0_i32 = arith.constant 0 : i32
    %c0_i32_0 = arith.constant 0 : i32
    return %arg0, %c0_i32 : i32, i32
  }
  func.func @transform_1(%arg0: i32) -> (i32, i32, i32) {
    %c0_i32 = arith.constant 0 : i32
    %c0_i32_0 = arith.constant 0 : i32
    %c0_i32_1 = arith.constant 0 : i32
    %c0_i32_2 = arith.constant 0 : i32
    return %c0_i32, %c0_i32_0, %c0_i32_1 : i32, i32, i32
  }
  func.func @transform_2(%arg0: i32) -> (i32, i32, i32) {
    %c0_i32 = arith.constant 0 : i32
    %c0_i32_0 = arith.constant 0 : i32
    %c0_i32_1 = arith.constant 0 : i32
    %c0_i32_2 = arith.constant 0 : i32
    return %c0_i32, %c0_i32_0, %c0_i32_1 : i32, i32, i32
  }
  func.func @transform_3(%arg0: i32) -> (i32, i32) {
    %c0_i32 = arith.constant 0 : i32
    %c0_i32_0 = arith.constant 0 : i32
    return %arg0, %c0_i32 : i32, i32
  }
}

</mosaic_0001>

<bundles_post_ra>
// kernel: forward.1
= control target key start
LH: loop header
LB: loop body
LE: loop exit
PB: predicated region body
PF: predicated region fallthrough
CT: control target
= control target key end

     0   :  { %8 = vsyncpa [#allocation3], 0  ;;  %s696_s0 = inlined_call_operand.hbm [shape: f32[8,32], index: 0, kind: input, shape index: {}]   ;;  %s697_s1 = inlined_call_operand.hbm [shape: f32[3,128,128], index: 1, kind: input, shape index: {}]   ;;  %s698_s2 = inlined_call_operand.hbm [shape: f32[3,1,128], index: 2, kind: input, shape index: {}]   ;;  %s699_s3 = inlined_call_operand.vmem [shape: f32[8,384], index: 3, kind: output, shape index: {}]  }
   0x1   :  { %9 = vsyncpa [#allocation5], 0  ;;  %s600_s12 = smov [#allocation4]   ;;  %s530_s16 = scalar_lea.hbm %s697_s1, 6144 }
   0x2   :  { %s25_s13 = sshll.u32 %s600_s12, 4  ;;  %p531_p0 = scmp.ne.s32.totalorder %s697_s1, %s530_s16  ;;  %s26_s13 = int_to_ptr.vmem [resolvable:$true] %s25_s13 }
   0x3   :  { %p534_p1 = scmp.lt.u32.totalorder %s530_s16, %s697_s1 }
   0x5   :  { %p536_p2 = pnand %p534_p1, %p531_p0 }
   0x7   :  { %539 = shalt.err (!%p536_p2)
}
   0x8   :  { %s540_s21 = scalar_lea.vmem %s26_s13, 6144  ;;  %p545_p4 = scmp.lt.s32.totalorder %s26_s13, %s26_s13 }
   0x9   :  { %p541_p3 = scmp.ne.s32.totalorder %s26_s13, %s540_s21  ;;  %p546_p5 = scmp.lt.s32.totalorder %s540_s21, %s540_s21 }
   0xb   :  { %p547_p6 = por %p546_p5, %p545_p4 }
   0xd   :  { %p548_p7 = pnand %p547_p6, %p541_p3 }
   0xf   :  { %551 = shalt.err (!%p548_p7)
}
  0x10   :  { %s601_s22 = smov 128   ;;  %s602_s23 = smov 8  }
  0x11   :  { %31 = dma.hbm_to_vmem [thread:$0]  %s697_s1, 6144, %s26_s13, [#allocation5], %s601_s22, %s601_s22, %s602_s23  }
  0x12   :  { %s603_s26 = smov [#allocation2]   ;;  %s604_s28 = smov [#allocation6]  }
  0x13   :  { %s16_s27 = sshll.u32 %s603_s26, 4  ;;  %s37_s29 = sshll.u32 %s604_s28, 4  ;;  %s17_s27 = int_to_ptr.vmem [resolvable:$true] %s16_s27  ;;  %s38_s29 = int_to_ptr.vmem [resolvable:$true] %s37_s29 }
  0x14   :  { %s552_s5 = scalar_lea.hbm %s696_s0, 128 }
  0x15   :  { %p553_p8 = scmp.ne.s32.totalorder %s696_s0, %s552_s5  ;;  %p556_p9 = scmp.lt.u32.totalorder %s552_s5, %s696_s0 }
  0x17   :  { %p558_p10 = pnand %p556_p9, %p553_p8 }
  0x19   :  { %561 = shalt.err (!%p558_p10)
}
  0x1a   :  { %s562_s1 = scalar_lea.vmem %s17_s27, 128  ;;  %p567_p12 = scmp.lt.s32.totalorder %s17_s27, %s17_s27 }
  0x1b   :  { %p563_p11 = scmp.ne.s32.totalorder %s17_s27, %s562_s1  ;;  %p568_p13 = scmp.lt.s32.totalorder %s562_s1, %s562_s1 }
  0x1d   :  { %p569_p0 = por %p568_p13, %p567_p12 }
  0x1f   :  { %p570_p1 = pnand %p569_p0, %p563_p11 }
  0x21   :  { %573 = shalt.err (!%p570_p1)
}
  0x22   :  { %19 = dma.hbm_to_vmem [thread:$0]  %s696_s0, 128, %s17_s27, [#allocation3]  }
  0x23   :  { %s574_s14 = scalar_lea.hbm %s698_s2, 48 }
  0x24   :  { %p575_p2 = scmp.ne.s32.totalorder %s698_s2, %s574_s14  ;;  %p578_p3 = scmp.lt.u32.totalorder %s574_s14, %s698_s2 }
  0x26   :  { %p580_p4 = pnand %p578_p3, %p575_p2 }
  0x28   :  { %583 = shalt.err (!%p580_p4)
}
  0x29   :  { %s584_s19 = scalar_lea.vmem %s38_s29, 48  ;;  %s588_s20 = scalar_lea.vmem %s38_s29, 64 }
  0x2a   :  { %p585_p5 = scmp.ne.s32.totalorder %s38_s29, %s584_s19  ;;  %p589_p6 = scmp.lt.s32.totalorder %s38_s29, %s38_s29 }
  0x2b   :  { %p590_p7 = scmp.lt.s32.totalorder %s588_s20, %s584_s19 }
  0x2d   :  { %p591_p8 = por %p590_p7, %p589_p6 }
  0x2f   :  { %p592_p9 = pnand %p591_p8, %p585_p5 }
  0x31   :  { %595 = shalt.err (!%p592_p9)
}
  0x32   :  { %s605_s0 = smov 16   ;;  %s606_s21 = smov 1  }
  0x33   :  { %43 = dma.hbm_to_vmem [thread:$0]  %s698_s2, 48, %s38_s29, [#allocation5], %s605_s0, %s605_s0, %s606_s21  }
  0x34   :  { %596 = dma.done.wait [#allocation3], 128  }
  0x35   :  { %597 = vsyncadd [#allocation3], 4294967168 }
  0x36   :  { %598 = dma.done.wait [#allocation5], 6192  }
  0x37   :  { %599 = vsyncadd [#allocation5], 4294961104  ;;  %v607_v0 = vmov 0.0|0.0   ;;  %vm608_vm0 = vmmov 0   ;;  %v609_v1 = vmov 0.0   ;;  %v54_v2 = vld [vmem:[#allocation4] sm:$0xff] }
  0x38   :  { %466 = vmatprep.subr.bf16.mxu0 %v607_v0  ;;  %393 = vmatprep.mubr.msk.f32.mxu0 %vm608_vm0, %v609_v1  ;;  %v55_v3 = vld [vmem:[#allocation4 + $0x8] sm:$0xff]  ;;  %v56_v4 = vld [vmem:[#allocation4 + $0x10] sm:$0xff]  ;;  %v57_v6 = vld [vmem:[#allocation4 + $0x18] sm:$0xff]  ;;  %vm65_vm1 = vcmask 261120  }
  0x39   :  { %472 = vmatprep.subr.bf16.mxu1 %v607_v0  ;;  %428 = vmatprep.mubr.msk.f32.mxu1 %vm608_vm0, %v609_v1  ;;  %v467_v5 = vpack.c.bf16 %v55_v3, %v54_v2  ;;  %v143_v7 = vld [vmem:[#allocation4 + $0x80] sm:$0xff]  ;;  %v144_v8 = vld [vmem:[#allocation4 + $0x88] sm:$0xff]  ;;  %v145_v9 = vld [vmem:[#allocation4 + $0x90] sm:$0xff]  ;;  %v470_v11 = vpack.c.bf16 %v57_v6, %v56_v4 }
  0x3a   :  { %v146_v10 = vld [vmem:[#allocation4 + $0x98] sm:$0xff]  ;;  %v473_v12 = vpack.c.bf16 %v144_v8, %v143_v7  ;;  %v147_v14 = vld [vmem:[#allocation4 + $0xa0] sm:$0xff]  ;;  %v148_v15 = vld [vmem:[#allocation4 + $0xa8] sm:$0xff] }
  0x3b   :  { %468 = vmatpush3.bf16.msra.mxu0 %v467_v5  ;;  %v476_v13 = vpack.c.bf16 %v146_v10, %v145_v9  ;;  %v53_v16 = vld [vmem:[#allocation2] sm:$0xff]  ;;  %v479_v17 = vpack.c.bf16 %v148_v15, %v147_v14  ;;  %v149_v18 = vld [vmem:[#allocation4 + $0xb0] sm:$0xff]  ;;  %v151_v21 = vld [vmem:[#allocation4 + $0xc0] sm:$0xff] }
  0x3c   :  { %469 = vmatprep.subr.bf16.mxu0 %v607_v0  ;;  %474 = vmatpush3.bf16.msra.mxu1 %v473_v12  ;;  %v150_v19 = vld [vmem:[#allocation4 + $0xb8] sm:$0xff]  ;;  %v152_v22 = vld [vmem:[#allocation4 + $0xc8] sm:$0xff]  ;;  %v153_v24 = vld [vmem:[#allocation4 + $0xd0] sm:$0xff] }
  0x3d   :  { %475 = vmatprep.subr.bf16.mxu1 %v607_v0  ;;  %v482_v20 = vpack.c.bf16 %v150_v19, %v149_v18  ;;  %v485_v23 = vpack.c.bf16 %v152_v22, %v151_v21  ;;  %v154_v25 = vld [vmem:[#allocation4 + $0xd8] sm:$0xff]  ;;  %v155_v27 = vld [vmem:[#allocation4 + $0xe0] sm:$0xff]  ;;  %v156_v28 = vld [vmem:[#allocation4 + $0xe8] sm:$0xff] }
  0x3e   :  { %v488_v26 = vpack.c.bf16 %v154_v25, %v153_v24  ;;  %v491_v29 = vpack.c.bf16 %v156_v28, %v155_v27  ;;  %v157_v30 = vld [vmem:[#allocation4 + $0xf0] sm:$0xff]  ;;  %v158_v31 = vld [vmem:[#allocation4 + $0xf8] sm:$0xff]  ;;  %v241_v33 = vld [vmem:[#allocation4 + $0x100] sm:$0xff] }
  0x3f   :  { %471 = vmatpush3.bf16.msra.mxu0 %v470_v11  ;;  %v494_v32 = vpack.c.bf16 %v158_v31, %v157_v30  ;;  %v242_v34 = vld [vmem:[#allocation4 + $0x108] sm:$0xff]  ;;  %v243_v35 = vld [vmem:[#allocation4 + $0x110] sm:$0xff]  ;;  %v244_v37 = vld [vmem:[#allocation4 + $0x118] sm:$0xff] }
  0x40   :  { %496 = vmatprep.subr.bf16.mxu0 %v607_v0  ;;  %477 = vmatpush3.bf16.msra.mxu1 %v476_v13  ;;  %v497_v36 = vpack.c.bf16 %v242_v34, %v241_v33  ;;  %v500_v38 = vpack.c.bf16 %v244_v37, %v243_v35  ;;  %v245_v39 = vld [vmem:[#allocation4 + $0x120] sm:$0xff]  ;;  %v246_v40 = vld [vmem:[#allocation4 + $0x128] sm:$0xff]  ;;  %v247_v42 = vld [vmem:[#allocation4 + $0x130] sm:$0xff] }
  0x41   :  { %478 = vmatprep.subr.bf16.mxu1 %v607_v0  ;;  %v503_v41 = vpack.c.bf16 %v246_v40, %v245_v39  ;;  %v248_v43 = vld [vmem:[#allocation4 + $0x138] sm:$0xff]  ;;  %v249_v45 = vld [vmem:[#allocation4 + $0x140] sm:$0xff]  ;;  %v250_v46 = vld [vmem:[#allocation4 + $0x148] sm:$0xff] }
  0x42   :  { %394 = vmatmul.mubr.msk.f32.vlgmr.msra.gmra.mrb[0].mxu0 %vm65_vm1, %v53_v16  ;;  %v506_v44 = vpack.c.bf16 %v248_v43, %v247_v42  ;;  %v509_v47 = vpack.c.bf16 %v250_v46, %v249_v45  ;;  %v251_v48 = vld [vmem:[#allocation4 + $0x150] sm:$0xff]  ;;  %v252_v49 = vld [vmem:[#allocation4 + $0x158] sm:$0xff]  ;;  %v342_v51 = vld [vmem:[#allocation6] ss:$0 sm:$0xff] }
  0x43   :  { %463 = vmatprep.mubr.msk.f32.mxu0 %vm608_vm0, %v609_v1  ;;  %498 = vmatpush3.bf16.msra.mxu0 %v497_v36  ;;  %v512_v50 = vpack.c.bf16 %v252_v49, %v251_v48  ;;  %v253_v57 = vld [vmem:[#allocation4 + $0x160] sm:$0xff]  ;;  %v254_v58 = vld [vmem:[#allocation4 + $0x168] sm:$0xff]  ;;  %v255_v60 = vld [vmem:[#allocation4 + $0x170] sm:$0xff] }
  0x44   :  { %480 = vmatpush3.bf16.msra.mxu1 %v479_v17  ;;  %499 = vmatprep.subr.bf16.mxu0 %v607_v0  ;;  %v515_v59 = vpack.c.bf16 %v254_v58, %v253_v57  ;;  %v256_v61 = vld [vmem:[#allocation4 + $0x178] sm:$0xff]  ;;  %v344_v63 = vld [vmem:[#allocation6 + $0x1] ss:$0 sm:$0xff]  ;;  %v345_v6 = vld [vmem:[#allocation6 + $0x2] ss:$0 sm:$0xff] }
  0x45   :  { %481 = vmatprep.subr.bf16.mxu1 %v607_v0  ;;  %v518_v62 = vpack.c.bf16 %v256_v61, %v255_v60 }
  0x47   :  { %501 = vmatpush3.bf16.msra.mxu0 %v500_v38 }
  0x48   :  { %483 = vmatpush3.bf16.msra.mxu1 %v482_v20  ;;  %502 = vmatprep.subr.bf16.mxu0 %v607_v0 }
  0x49   :  { %484 = vmatprep.subr.bf16.mxu1 %v607_v0 }
  0x4b   :  { %504 = vmatpush3.bf16.msra.mxu0 %v503_v41 }
  0x4c   :  { %486 = vmatpush3.bf16.msra.mxu1 %v485_v23  ;;  %505 = vmatprep.subr.bf16.mxu0 %v607_v0 }
  0x4d   :  { %487 = vmatprep.subr.bf16.mxu1 %v607_v0 }
  0x4f   :  { %507 = vmatpush3.bf16.msra.mxu0 %v506_v44 }
  0x50   :  { %489 = vmatpush3.bf16.msra.mxu1 %v488_v26  ;;  %508 = vmatprep.subr.bf16.mxu0 %v607_v0 }
  0x51   :  { %490 = vmatprep.subr.bf16.mxu1 %v607_v0 }
  0x53   :  { %510 = vmatpush3.bf16.msra.mxu0 %v509_v47 }
  0x54   :  { %492 = vmatpush3.bf16.msra.mxu1 %v491_v29  ;;  %511 = vmatprep.subr.bf16.mxu0 %v607_v0 }
  0x55   :  { %493 = vmatprep.subr.bf16.mxu1 %v607_v0 }
  0x57   :  { %513 = vmatpush3.bf16.msra.mxu0 %v512_v50 }
  0x58   :  { %495 = vmatpush3.bf16.msra.mxu1 %v494_v32  ;;  %514 = vmatprep.subr.bf16.mxu0 %v607_v0 }
  0x5b   :  { %516 = vmatpush3.bf16.msra.mxu0 %v515_v59 }
  0x5c   :  { %517 = vmatprep.subr.bf16.mxu0 %v607_v0 }
  0x5f   :  { %519 = vmatpush3.bf16.msra.mxu0 %v518_v62 }
 0x115   :  { %v135_v52 = vpop.f32.mrb[0].mxu0 }
 0x116   :  { %v136_v53 = vadd.f32 %v342_v51, %v135_v52  ;;  %v395_v54 = vpop.f32.mrb[1].mxu0 }
 0x118   :  { %v139_v55 = vmul.f32 0.01, %v136_v53 }
 0x11a   :  { %v140_v56 = vmax.f32 %v136_v53, %v139_v55 }
 0x11c   :  { %141 = vst [vmem:[%s699_s3] sm:$0xff] %v140_v56  ;;  %429 = vmatmul.mubr.f32.vlgmr.msra.gmra.mrb[0].mxu1 %v140_v56 }
 0x1ef   :  { %v233_v1 = vpop.f32.mrb[0].mxu1 }
 0x1f0   :  { %v234_v2 = vadd.f32 %v344_v63, %v233_v1  ;;  %v430_v3 = vpop.f32.mrb[1].mxu1 }
 0x1f2   :  { %v237_v4 = vmul.f32 0.01, %v234_v2 }
 0x1f4   :  { %v238_v5 = vmax.f32 %v234_v2, %v237_v4 }
 0x1f6   :  { %239 = vst [vmem:[%s699_s3 + $0x8] sm:$0xff] %v238_v5  ;;  %464 = vmatmul.mubr.f32.vlgmr.msra.gmra.mrb[2].mxu0 %v238_v5 }
 0x2c9   :  { %v331_v7 = vpop.f32.mrb[2].mxu0 }
 0x2ca   :  { %v332_v8 = vadd.f32 %v345_v6, %v331_v7  ;;  %v465_v9 = vpop.f32.mrb[3].mxu0 }
 0x2cc   :  { %335 = vst [vmem:[%s699_s3 + $0x10] sm:$0xff] %v332_v8 }
 0x2cd   :  { %340 = vsyncpa [#allocation3], 1 }
 0x2ce   :  { %341 = vsyncpa [#allocation5], 1 }

</bundles_post_ra>
